<compile_context>
chip_gen: v7x
topology: tpu7x:2x2x1
jax: 0.10.0
libtpu: 0.0.40
codegen_flags: <defaults>
</compile_context>

<pallas_src>
import functools

import jax
import jax.numpy as jnp
from jax import lax
from jax.experimental import pallas as pl
from jax.experimental.pallas import tpu as pltpu


def _round_up(x: int, m: int) -> int:
    return ((x + m - 1) // m) * m


def _ls_ce_kernel(x_ref, t_ref, out_ref, loss_acc, nll_acc, *,
                  eps: float, n_valid: int, n_classes: int, tile_n: int):
    i = pl.program_id(0)

    @pl.when(i == 0)
    def _init():
        loss_acc[...] = jnp.zeros_like(loss_acc)
        nll_acc[...] = jnp.zeros_like(nll_acc)

    # (C, TILE_N): classes on sublanes, batch on lanes. Keep math in f32.
    x = x_ref[...].astype(jnp.float32)
    tgt = t_ref[...]                                           # (1, TILE_N) int32

    m = jnp.max(x, axis=0, keepdims=True)                      # (1, TILE_N)
    lse = jnp.log(jnp.sum(jnp.exp(x - m), axis=0, keepdims=True))
    mlse = m + lse                                             # logsumexp(x) per row
    sum_x = jnp.sum(x, axis=0, keepdims=True)                  # (1, TILE_N)

    # Gather x[i, target[i]] via a one-hot compare over the class (sublane) axis.
    cls = lax.broadcasted_iota(jnp.int32, x.shape, 0)          # (C, TILE_N)
    onehot = (cls == tgt).astype(jnp.float32)
    x_tgt = jnp.sum(x * onehot, axis=0, keepdims=True)         # (1, TILE_N)

    # Per-row contributions (no logp array materialized):
    #   -sum_c logp = C * (m + lse) - sum_c x
    #   -logp[tgt]  = (m + lse) - x[tgt]
    loss_col = float(n_classes) * mlse - sum_x                 # (1, TILE_N)
    nll_col = mlse - x_tgt                                     # (1, TILE_N)

    if n_valid % tile_n != 0:
        # Mask padded batch columns of the (single) partial tile.
        col = i * tile_n + lax.broadcasted_iota(jnp.int32, (1, tile_n), 1)
        valid = (col < n_valid).astype(jnp.float32)
        loss_col = loss_col * valid
        nll_col = nll_col * valid

    loss_acc[...] += loss_col
    nll_acc[...] += nll_col

    @pl.when(i == pl.num_programs(0) - 1)
    def _finalize():
        loss_sum = jnp.sum(loss_acc[...], axis=1, keepdims=True)   # (1, 1)
        nll_sum = jnp.sum(nll_acc[...], axis=1, keepdims=True)     # (1, 1)
        coef_loss = eps / (n_classes * n_valid)                    # folds mean & /C
        coef_nll = (1.0 - eps) / n_valid                           # folds mean
        out_ref[...] = coef_loss * loss_sum + coef_nll * nll_sum


def label_smoothing_cross_entropy(output, target, eps: float = 0.1, tile_n: int = 512):
    """output: (N, C) float logits; target: (N,) int labels. reduction='mean'."""
    n, c = output.shape

    # Batch maps to lanes: (C, N) logits, (1, N) targets.
    x_t = output.T
    tgt = target.astype(jnp.int32).reshape(1, n)

    # Lane-aligned batch tiles; small per-block footprint (double-buffered) for
    # every TPU generation (v5e/v6e/v7x).
    tile_n = min(tile_n, _round_up(n, 128))
    n_pad = _round_up(n, tile_n)
    if n_pad != n:
        x_t = jnp.pad(x_t, ((0, 0), (0, n_pad - n)))
        tgt = jnp.pad(tgt, ((0, 0), (0, n_pad - n)))
    num_tiles = n_pad // tile_n

    kernel = functools.partial(
        _ls_ce_kernel, eps=float(eps), n_valid=n, n_classes=c, tile_n=tile_n)

    out = pl.pallas_call(
        kernel,
        out_shape=jax.ShapeDtypeStruct((1, 1), jnp.float32),
        grid_spec=pltpu.PrefetchScalarGridSpec(
            num_scalar_prefetch=0,
            grid=(num_tiles,),
            in_specs=[
                pl.BlockSpec((c, tile_n), lambda i: (0, i)),
                pl.BlockSpec((1, tile_n), lambda i: (0, i)),
            ],
            out_specs=pl.BlockSpec((1, 1), lambda i: (0, 0)),
            scratch_shapes=[
                pltpu.VMEM((1, tile_n), jnp.float32),   # lane-wise loss accumulator
                pltpu.VMEM((1, tile_n), jnp.float32),   # lane-wise nll accumulator
            ],
        ),
        compiler_params=pltpu.CompilerParams(
            dimension_semantics=("arbitrary",)),        # accumulator across batch tiles
    )(x_t, tgt)
    return out[0, 0]


def _reference(output, target, eps=0.1):
    # Pure-JAX reference mirroring the PyTorch module.
    logp = jax.nn.log_softmax(output.astype(jnp.float32), axis=-1)
    c = output.shape[-1]
    loss = jnp.mean(-jnp.sum(logp, axis=-1))
    nll = jnp.mean(-jnp.take_along_axis(logp, target[:, None], axis=-1)[:, 0])
    return eps * (loss / c) + (1.0 - eps) * nll


if __name__ == "__main__":
    key = jax.random.PRNGKey(0)
    k1, k2 = jax.random.split(key)

    # plant-pathology: 4 classes.
    N, C = 8, 4
    logits = jax.random.normal(k1, (N, C), dtype=jnp.float32)
    target = jax.random.randint(k2, (N,), 0, C, dtype=jnp.int32)

    result = jax.block_until_ready(label_smoothing_cross_entropy(logits, target, eps=0.1))
    ref = _reference(logits, target, eps=0.1)
    assert jnp.allclose(result, ref, atol=1e-5, rtol=1e-4), (result, ref)

    # Exercise multi-tile accumulation + masked partial tail tile (3 tiles of 128).
    k3, k4 = jax.random.split(k2)
    N2 = 300
    logits2 = jax.random.normal(k3, (N2, C), dtype=jnp.float32)
    target2 = jax.random.randint(k4, (N2,), 0, C, dtype=jnp.int32)
    result2 = jax.block_until_ready(
        label_smoothing_cross_entropy(logits2, target2, eps=0.1, tile_n=128))
    ref2 = _reference(logits2, target2, eps=0.1)
    assert jnp.allclose(result2, ref2, atol=1e-5, rtol=1e-4), (result2, ref2)

    print("KERNEL_OK")
</pallas_src>

<mosaic_0001>
module attributes {stable_mosaic.version = 11 : i64} {
  func.func @_ls_ce_kernel(%arg0: i32, %arg1: memref<4x128xf32, #tpu.memory_space<vmem>>, %arg2: memref<1x128xi32, #tpu.memory_space<vmem>>, %arg3: memref<1x1xf32, #tpu.memory_space<vmem>>, %arg4: memref<1x128xf32, #tpu.memory_space<vmem>>, %arg5: memref<1x128xf32, #tpu.memory_space<vmem>>) attributes {dimension_semantics = [#tpu.dimension_semantics<arbitrary>], iteration_bounds = array<i64: 1>, scalar_prefetch = 0 : i64, scratch_operands = 2 : i64, tpu.core_type = #tpu.core_type<tc>, window_params = [{transform_indices = @transform_0, window_bounds = array<i64: 4, 128>}, {transform_indices = @transform_1, window_bounds = array<i64: 1, 128>}, {pipeline_mode = #tpu.pipeline_mode<synchronous>, transform_indices = @transform_2, window_bounds = array<i64: 1, 1>}]} {
    %c0_i32 = arith.constant 0 : i32
    %0 = arith.cmpi eq, %arg0, %c0_i32 : i32
    %1 = arith.extui %0 : i1 to i32
    %c0_i32_0 = arith.constant 0 : i32
    %2 = arith.cmpi ne, %1, %c0_i32_0 : i32
    scf.if %2 {
      %cst_18 = arith.constant 0.000000e+00 : f32
      %47 = vector.broadcast %cst_18 : f32 to vector<1x128xf32>
      %c0_19 = arith.constant 0 : index
      %c0_20 = arith.constant 0 : index
      %48 = vector.load %arg4[%c0_19, %c0_20] : memref<1x128xf32, #tpu.memory_space<vmem>>, vector<1x128xf32>
      tpu.vector_store %arg4[%c0_19, %c0_20], %47 {strides = array<i32>} : memref<1x128xf32, #tpu.memory_space<vmem>>, vector<1x128xf32>,
      %cst_21 = arith.constant 0.000000e+00 : f32
      %49 = vector.broadcast %cst_21 : f32 to vector<1x128xf32>
      %c0_22 = arith.constant 0 : index
      %c0_23 = arith.constant 0 : index
      %50 = vector.load %arg5[%c0_22, %c0_23] : memref<1x128xf32, #tpu.memory_space<vmem>>, vector<1x128xf32>
      tpu.vector_store %arg5[%c0_22, %c0_23], %49 {strides = array<i32>} : memref<1x128xf32, #tpu.memory_space<vmem>>, vector<1x128xf32>,
    } else {
    }
    %c0 = arith.constant 0 : index
    %c0_1 = arith.constant 0 : index
    %3 = vector.load %arg1[%c0, %c0_1] : memref<4x128xf32, #tpu.memory_space<vmem>>, vector<4x128xf32>
    %c0_2 = arith.constant 0 : index
    %c0_3 = arith.constant 0 : index
    %4 = vector.load %arg2[%c0_2, %c0_3] : memref<1x128xi32, #tpu.memory_space<vmem>>, vector<1x128xi32>
    %cst = arith.constant dense<0xFF800000> : vector<128xf32>
    %5 = vector.multi_reduction <maximumf>, %3, %cst [0] : vector<4x128xf32> to vector<128xf32>
    %6 = vector.shape_cast %5 : vector<128xf32> to vector<1x128xf32>
    %7 = vector.broadcast %6 : vector<1x128xf32> to vector<4x128xf32>
    %8 = arith.subf %3, %7 : vector<4x128xf32>
    %9 = math.exp %8 : vector<4x128xf32>
    %cst_4 = arith.constant dense<0.000000e+00> : vector<128xf32>
    %10 = vector.multi_reduction <add>, %9, %cst_4 [0] : vector<4x128xf32> to vector<128xf32>
    %11 = vector.shape_cast %10 : vector<128xf32> to vector<1x128xf32>
    %12 = math.log %11 : vector<1x128xf32>
    %13 = arith.addf %6, %12 : vector<1x128xf32>
    %cst_5 = arith.constant dense<0.000000e+00> : vector<128xf32>
    %14 = vector.multi_reduction <add>, %3, %cst_5 [0] : vector<4x128xf32> to vector<128xf32>
    %15 = vector.shape_cast %14 : vector<128xf32> to vector<1x128xf32>
    %16 = tpu.iota {dimensions = array<i32: 0>} : vector<4x128xi32>
    %17 = vector.broadcast %4 : vector<1x128xi32> to vector<4x128xi32>
    %18 = arith.cmpi eq, %16, %17 : vector<4x128xi32>
    %19 = arith.extui %18 : vector<4x128xi1> to vector<4x128xi32>
    %20 = arith.sitofp %19 : vector<4x128xi32> to vector<4x128xf32>
    %21 = arith.mulf %3, %20 : vector<4x128xf32>
    %cst_6 = arith.constant dense<0.000000e+00> : vector<128xf32>
    %22 = vector.multi_reduction <add>, %21, %cst_6 [0] : vector<4x128xf32> to vector<128xf32>
    %23 = vector.shape_cast %22 : vector<128xf32> to vector<1x128xf32>
    %cst_7 = arith.constant 4.000000e+00 : f32
    %24 = vector.broadcast %cst_7 : f32 to vector<1x128xf32>
    %25 = arith.mulf %24, %13 : vector<1x128xf32>
    %26 = arith.subf %25, %15 : vector<1x128xf32>
    %27 = arith.subf %13, %23 : vector<1x128xf32>
    %c128_i32 = arith.constant 128 : i32
    %28 = arith.muli %arg0, %c128_i32 : i32
    %29 = tpu.iota {dimensions = array<i32: 1>} : vector<1x128xi32>
    %30 = vector.broadcast %28 : i32 to vector<1x128xi32>
    %31 = arith.addi %30, %29 : vector<1x128xi32>
    %c8_i32 = arith.constant 8 : i32
    %32 = vector.broadcast %c8_i32 : i32 to vector<1x128xi32>
    %33 = arith.cmpi slt, %31, %32 : vector<1x128xi32>
    %34 = arith.extui %33 : vector<1x128xi1> to vector<1x128xi32>
    %35 = arith.sitofp %34 : vector<1x128xi32> to vector<1x128xf32>
    %36 = arith.mulf %26, %35 : vector<1x128xf32>
    %37 = arith.mulf %27, %35 : vector<1x128xf32>
    %c0_8 = arith.constant 0 : index
    %c0_9 = arith.constant 0 : index
    %38 = vector.load %arg4[%c0_8, %c0_9] : memref<1x128xf32, #tpu.memory_space<vmem>>, vector<1x128xf32>
    %39 = arith.addf %38, %36 : vector<1x128xf32>
    %c0_10 = arith.constant 0 : index
    %c0_11 = arith.constant 0 : index
    %40 = vector.load %arg4[%c0_10, %c0_11] : memref<1x128xf32, #tpu.memory_space<vmem>>, vector<1x128xf32>
    tpu.vector_store %arg4[%c0_10, %c0_11], %39 {strides = array<i32>} : memref<1x128xf32, #tpu.memory_space<vmem>>, vector<1x128xf32>,
    %c0_12 = arith.constant 0 : index
    %c0_13 = arith.constant 0 : index
    %41 = vector.load %arg5[%c0_12, %c0_13] : memref<1x128xf32, #tpu.memory_space<vmem>>, vector<1x128xf32>
    %42 = arith.addf %41, %37 : vector<1x128xf32>
    %c0_14 = arith.constant 0 : index
    %c0_15 = arith.constant 0 : index
    %43 = vector.load %arg5[%c0_14, %c0_15] : memref<1x128xf32, #tpu.memory_space<vmem>>, vector<1x128xf32>
    tpu.vector_store %arg5[%c0_14, %c0_15], %42 {strides = array<i32>} : memref<1x128xf32, #tpu.memory_space<vmem>>, vector<1x128xf32>,
    %c0_i32_16 = arith.constant 0 : i32
    %44 = arith.cmpi eq, %arg0, %c0_i32_16 : i32
    %45 = arith.extui %44 : i1 to i32
    %c0_i32_17 = arith.constant 0 : i32
    %46 = arith.cmpi ne, %45, %c0_i32_17 : i32
    scf.if %46 {
      %c0_18 = arith.constant 0 : index
      %c0_19 = arith.constant 0 : index
      %47 = vector.load %arg4[%c0_18, %c0_19] : memref<1x128xf32, #tpu.memory_space<vmem>>, vector<1x128xf32>
      %cst_20 = arith.constant dense<0.000000e+00> : vector<1xf32>
      %48 = vector.multi_reduction <add>, %47, %cst_20 [1] : vector<1x128xf32> to vector<1xf32>
      %49 = vector.shape_cast %48 : vector<1xf32> to vector<1x1xf32>
      %c0_21 = arith.constant 0 : index
      %c0_22 = arith.constant 0 : index
      %50 = vector.load %arg5[%c0_21, %c0_22] : memref<1x128xf32, #tpu.memory_space<vmem>>, vector<1x128xf32>
      %cst_23 = arith.constant dense<0.000000e+00> : vector<1xf32>
      %51 = vector.multi_reduction <add>, %50, %cst_23 [1] : vector<1x128xf32> to vector<1xf32>
      %52 = vector.shape_cast %51 : vector<1xf32> to vector<1x1xf32>
      %cst_24 = arith.constant 3.125000e-03 : f32
      %53 = vector.broadcast %cst_24 : f32 to vector<1x1xf32>
      %54 = arith.mulf %53, %49 : vector<1x1xf32>
      %cst_25 = arith.constant 1.125000e-01 : f32
      %55 = vector.broadcast %cst_25 : f32 to vector<1x1xf32>
      %56 = arith.mulf %55, %52 : vector<1x1xf32>
      %57 = arith.addf %54, %56 : vector<1x1xf32>
      %c0_26 = arith.constant 0 : index
      %c0_27 = arith.constant 0 : index
      %58 = vector.load %arg3[%c0_26, %c0_27] : memref<1x1xf32, #tpu.memory_space<vmem>>, vector<1x1xf32>
      tpu.vector_store %arg3[%c0_26, %c0_27], %57 {strides = array<i32>} : memref<1x1xf32, #tpu.memory_space<vmem>>, vector<1x1xf32>,
    } else {
    }
    return
  }
  func.func @transform_0(%arg0: i32) -> (i32, i32) {
    %c0_i32 = arith.constant 0 : i32
    %c0_i32_0 = arith.constant 0 : i32
    return %c0_i32, %arg0 : i32, i32
  }
  func.func @transform_1(%arg0: i32) -> (i32, i32) {
    %c0_i32 = arith.constant 0 : i32
    %c0_i32_0 = arith.constant 0 : i32
    return %c0_i32, %arg0 : i32, i32
  }
  func.func @transform_2(%arg0: i32) -> (i32, i32) {
    %c0_i32 = arith.constant 0 : i32
    %c0_i32_0 = arith.constant 0 : i32
    %c0_i32_1 = arith.constant 0 : i32
    return %c0_i32, %c0_i32_0 : i32, i32
  }
}

</mosaic_0001>

<bundles_post_ra>
// kernel: tpu_custom_call.1
= control target key start
LH: loop header
LB: loop body
LE: loop exit
PB: predicated region body
PF: predicated region fallthrough
CT: control target
= control target key end

     0   :  { %7 = vsyncpa [#allocation5], 0  ;;  %s235_s0 = inlined_call_operand.hbm [shape: f32[4,128], index: 0, kind: input, shape index: {}]   ;;  %s236_s1 = inlined_call_operand.vmem [shape: s32[1,128], index: 1, kind: input, shape index: {}]   ;;  %s237_s2 = inlined_call_operand.hbm [shape: f32[1,1], index: 2, kind: output, shape index: {}]  }
   0x1   :  { %8 = vsyncpa [#allocation6], 0  ;;  %s186_s9 = smov [#allocation4]   ;;  %s138_s13 = scalar_lea.hbm %s235_s0, 64 }
   0x2   :  { %s15_s10 = sshll.u32 %s186_s9, 4  ;;  %p139_p0 = scmp.ne.s32.totalorder %s235_s0, %s138_s13  ;;  %s16_s10 = int_to_ptr.vmem [resolvable:$true] %s15_s10 }
   0x3   :  { %p142_p1 = scmp.lt.u32.totalorder %s138_s13, %s235_s0 }
   0x5   :  { %p144_p2 = pnand %p142_p1, %p139_p0 }
   0x7   :  { %147 = shalt.err (!%p144_p2)
}
   0x8   :  { %s148_s18 = scalar_lea.vmem %s16_s10, 64  ;;  %p153_p4 = scmp.lt.s32.totalorder %s16_s10, %s16_s10 }
   0x9   :  { %p149_p3 = scmp.ne.s32.totalorder %s16_s10, %s148_s18  ;;  %p154_p5 = scmp.lt.s32.totalorder %s148_s18, %s148_s18 }
   0xb   :  { %p155_p6 = por %p154_p5, %p153_p4 }
   0xd   :  { %p156_p7 = pnand %p155_p6, %p149_p3 }
   0xf   :  { %159 = shalt.err (!%p156_p7)
}
  0x10   :  { %18 = dma.hbm_to_vmem [thread:$0]  %s235_s0, 64, %s16_s10, [#allocation5]  }
  0x11   :  { %182 = dma.done.wait [#allocation5], 64  }
  0x12   :  { %183 = vsyncadd [#allocation5], 4294967232  ;;  %v187_v0 = vmov 0.0   ;;  %vm32_vm0 = vcmask 1043456   ;;  %v30_v1 = vld [vmem:[#allocation4] sm:$0xf]  ;;  %v60_v8 = vlaneseq }
  0x13   :  { %28 = vst [vmem:[#allocation2] sm:$0x1] %v187_v0  ;;  %29 = vst [vmem:[#allocation3] sm:$0x1] %v187_v0  ;;  %v33_v2 = vsel %vm32_vm0, %v30_v1, -inf  ;;  %v53_v21 = vsel %vm32_vm0, %v30_v1, 0.0 }
  0x14   :  { %v34_v3 = vrot.slane %v33_v2, 4  ;;  %v61_v11 = vshrl.u32 %v60_v8, 7  ;;  %v128_v13 = vld [vmem:[%s236_s1] ss:$0 sm:$0xff]  ;;  %v54_v24 = vrot.slane %v53_v21, 4  ;;  %v82_v36 = vand.u32 127, %v60_v8 }
  0x15   :  { %vm100_vm3 = vcmask 1040384   ;;  %s188_s1 = smov [#allocation7]   ;;  %vm111_vm4 = vcmask 0  }
  0x16   :  { %v35_v4 = vmax.f32 %v33_v2, %v34_v3  ;;  %vm66_vm1 = vcmp.eq.s32.totalorder %v61_v11, %v128_v13  ;;  %v55_v28 = vadd.f32 %v54_v24, %v53_v21  ;;  %vm85_vm2 = vcmp.lt.s32.totalorder %v82_v36, 8  ;;  %s119_s22 = sshll.u32 %s188_s1, 4  ;;  %s120_s22 = int_to_ptr.vmem [resolvable:$true] %s119_s22 }
  0x17   :  { %v129_v14 = vsel %vm66_vm1, 1.0, %v187_v0  ;;  %v130_v44 = vsel %vm85_vm2, 1.0, %v187_v0  ;;  %s160_s23 = scalar_lea.vmem %s120_s22, 16  ;;  %s164_s24 = scalar_lea.vmem %s120_s22, 32 }
  0x18   :  { %v36_v5 = vrot.slane %v35_v4, 2  ;;  %v69_v15 = vmul.f32 %v129_v14, %v30_v1  ;;  %v56_v31 = vrot.slane %v55_v28, 2  ;;  %p161_p8 = scmp.ne.s32.totalorder %s120_s22, %s160_s23  ;;  %p165_p9 = scmp.lt.s32.totalorder %s120_s22, %s120_s22 }
  0x19   :  { %p166_p10 = scmp.lt.s32.totalorder %s164_s24, %s160_s23 }
  0x1a   :  { %v37_v6 = vmax.f32 %v35_v4, %v36_v5  ;;  %v70_v18 = vsel %vm32_vm0, %v69_v15, 0.0  ;;  %v57_v33 = vadd.f32 %v56_v31, %v55_v28  ;;  %v93_v45 = vld [vmem:[#allocation3] sm:$0x1]  ;;  %v90_v48 = vld [vmem:[#allocation2] sm:$0x1] }
  0x1b   :  { %v71_v22 = vrot.slane %v70_v18, 4  ;;  %p167_p11 = por %p166_p10, %p165_p9 }
  0x1c   :  { %v38_v7 = vrot.slane %v37_v6, 1  ;;  %v58_v35 = vrot.slane %v57_v33, 1 }
  0x1d   :  { %v72_v26 = vadd.f32 %v71_v22, %v70_v18  ;;  %p168_p12 = pnand %p167_p11, %p161_p8 }
  0x1e   :  { %v39_v9 = vmax.f32 %v37_v6, %v38_v7  ;;  %v59_v41 = vadd.f32 %v58_v35, %v57_v33 }
  0x1f   :  { %v73_v30 = vrot.slane %v72_v26, 2 }
  0x20   :  { %v40_v10 = vsub.f32 %v30_v1, %v39_v9 }
  0x21   :  { %v74_v32 = vadd.f32 %v73_v30, %v72_v26 }
  0x22   :  { %v41_v12 = vmul.f32 1.442695, %v40_v10 }
  0x23   :  { %v75_v34 = vrot.slane %v74_v32, 1 }
  0x24   :  { %134 = vpow2.f32 %v41_v12 }
  0x25   :  { %v76_v39 = vadd.f32 %v75_v34, %v74_v32 }
  0x2e   :  { %v135_v16 = vpop.eup %134 }
  0x2f   :  { %v43_v17 = vsel %vm32_vm0, %v135_v16, 0.0 }
  0x30   :  { %v44_v19 = vrot.slane %v43_v17, 4 }
  0x32   :  { %v45_v20 = vadd.f32 %v44_v19, %v43_v17 }
  0x34   :  { %v46_v23 = vrot.slane %v45_v20, 2 }
  0x36   :  { %v47_v25 = vadd.f32 %v46_v23, %v45_v20 }
  0x38   :  { %v48_v27 = vrot.slane %v47_v25, 1 }
  0x3a   :  { %v49_v29 = vadd.f32 %v48_v27, %v47_v25 }
  0x3c   :  { %136 = vlog2.f32 %v49_v29 }
  0x46   :  { %v137_v37 = vpop.eup %136 }
  0x47   :  { %v51_v38 = vmul.f32 0.6931472, %v137_v37 }
  0x49   :  { %v52_v40 = vadd.f32 %v51_v38, %v39_v9 }
  0x4b   :  { %v77_v42 = vmul.f32 4.0, %v52_v40  ;;  %v79_v43 = vsub.f32 %v52_v40, %v76_v39 }
  0x4d   :  { %v78_v46 = vsub.f32 %v77_v42, %v59_v41  ;;  %v89_v47 = vmul.f32 %v130_v44, %v79_v43 }
  0x4f   :  { %v88_v49 = vmul.f32 %v130_v44, %v78_v46  ;;  %v94_v50 = vadd.f32 %v93_v45, %v89_v47 }
  0x51   :  { %v91_v51 = vadd.f32 %v90_v48, %v88_v49  ;;  %95 = vst [vmem:[#allocation3] sm:$0x1] %v94_v50 }
  0x53   :  { %92 = vst [vmem:[#allocation2] sm:$0x1] %v91_v51 }
  0x58   :  { %v104_v53 = vld [vmem:[#allocation3] sm:$0x1] }
  0x59   :  { %v105_v55 = vsel %vm100_vm3, %v104_v53, 0.0 }
  0x5a   :  { %v99_v52 = vld [vmem:[#allocation2] sm:$0x1] }
  0x5b   :  { %v101_v54 = vsel %vm100_vm3, %v99_v52, 0.0 }
  0x5c   :  { %102 = vadd.xlane.f32.xlu0 %v101_v54 }
  0x60   :  { %106 = vadd.xlane.f32.xlu0 %v105_v55 }
  0xe9   :  { %v103_v56 = vpop.xlane.xlu0 %102 }
  0xea   :  { %v108_v58 = vmul.f32 0.003125, %v103_v56 }
  0xed   :  { %v107_v57 = vpop.xlane.xlu0 %106 }
  0xee   :  { %v109_v59 = vmul.f32 0.1125, %v107_v57 }
  0xf0   :  { %v110_v60 = vadd.f32 %v109_v59, %v108_v58 }
  0xf2   :  { %112 = vst.msk [vmem:[#allocation7] sm:$0x1] %vm111_vm4, %v110_v60 }
  0xf3   :  { %171 = shalt.err (!%p168_p12)
}
  0xf4   :  { %s172_s27 = scalar_lea.hbm %s237_s2, 16 }
  0xf5   :  { %p173_p13 = scmp.ne.s32.totalorder %s237_s2, %s172_s27  ;;  %p176_p0 = scmp.lt.u32.totalorder %s172_s27, %s237_s2 }
  0xf7   :  { %p178_p1 = pnand %p176_p0, %p173_p13 }
  0xf9   :  { %181 = shalt.err (!%p178_p1)
}
  0xfa   :  { %122 = dma.vmem_to_hbm [thread:$0]  %s120_s22, 16, %s237_s2, [#allocation6]  }
  0xfb   :  { %184 = dma.done.wait [#allocation6], 16  }
  0xfc   :  { %185 = vsyncadd [#allocation6], 4294967280 }
  0xfd   :  { %126 = vsyncpa [#allocation5], 1 }
  0xfe   :  { %127 = vsyncpa [#allocation6], 1 }

</bundles_post_ra>
